<compile_context>
chip_gen: v7x
topology: tpu7x:2x2x1
jax: 0.10.0
libtpu: 0.0.40
codegen_flags: <defaults>
</compile_context>

<pallas_src>
import math
from functools import partial
from typing import NamedTuple, Tuple

import numpy as np
import jax
import jax.numpy as jnp
from jax.experimental import pallas as pl
from jax.experimental.pallas import tpu as pltpu

# ---------------- static problem sizes ----------------
D = 8            # joint dimension
K = 4            # ankle keypoints per foot
LANES = 128
MAX_LANE_TILE = 8192     # sweepable 2048..8192; 8192 keeps double-buffered blocks < v5e 16 MiB
NUM_GROUPS = 4
OUT_ROWS = 8             # output padded to 8 sublanes -> single unmasked store

# ---- state rows (component-per-sublane, 8-row aligned bands) ----
ROW_HEAD = 0
ROW_HBASE = 1
ROW_FX = 2            # contact_force[:-2]  (single x component)
ROW_FZ = 3            # contact_force[-1]
ROW_LFEET_H = 4
ROW_RFEET_H = 5
ROW_HIP = 6
ROW_WAIST = 7         # packed but unused (waist style weights cancel exactly)
ROW_SHOULDER_L = 8
ROW_SHOULDER_R = 9
ROW_ANGVEL = 10       # 2 rows (xy)
ROW_LINVEL = 12       # 2 rows
ROW_ORIENT = 14       # 2 rows
ROW_BASE_Q = 16       # 2 rows
ROW_FEET_Q = 18       # 2 rows
ROW_LANKLE = 20       # 4 rows
ROW_RANKLE = 24       # 4 rows
ROW_LFEET_POS = 28    # 3 rows (+1 pad)
ROW_RFEET_POS = 32    # 3 rows (+5 pad)
ROW_JVEL = 40         # 8 rows
ROW_JACC = 48
ROW_JTORQUE = 56
ROW_JPOS = 64
ROW_UPPER = 72
NUM_STATE_ROWS = 80

# ---- hyperparam rows (pre-broadcast to lane_tile lanes in the wrapper) ----
HP_JVEL_LIM = 0       # 8 rows
HP_JPOS_PD = 8
HP_JPOS_LOW = 16
HP_JPOS_HIGH = 24
HP_UPPER_TGT = 32
HP_STAGE2 = 40
HP_HEIGHT_TGT = 41
NUM_HP_ROWS = 48      # 42 used + 6 pad rows -> multiple of 8 sublanes

# ---- per-reward-fn weights (from DEFAULT_REWARD_CONFIG), grouped ----
W_TASK = (1.0, 1.0)
W_STYLE = (-10.0, -10.0 / 10.0, -0.25 / -10.0, -2.5, 2.5 / 2.5, 20.0, -10.0,
           0.0 / -25.0, 10.0, 1.0)
W_REG = (-2.5e-07, -0.01, -0.01, -2.5e-06, -2.5e-05, -0.0001, -0.25, -100.0, -1.0)
W_POST = (10.0, 10.0, 10.0, 10.0, 10.0, 2.5)

# waist appears twice in 'style' (indices 0 and 8) with exactly cancelling weights;
# shank (index 7) has exact-zero weight -> both are dropped from the kernel.
assert W_STYLE[0] + W_STYLE[8] == 0.0
assert W_STYLE[7] == 0.0

_FTOL_SCALE = math.sqrt(-2.0 * math.log(0.1))   # ftol(value_at_margin=0.1)


def _acc(acc, w, term):
    """Eager weighted accumulation with trace-time folding of 0/1 weights."""
    if w == 0.0:
        return acc
    t = term if w == 1.0 else w * term
    return t if acc is None else acc + t


# ---------------- Pallas kernel ----------------
def _reward_kernel(st_ref, hp_ref, out_ref, *,
                   joint_power_T, ankle_thres, feet_par_min, feet_dist_thres,
                   contact_ratio, max_hip, min_hip, shoulder_max, shoulder_min):
    def srow(i, n=1):               # (n, TILE) state rows, env per lane
        return st_ref[pl.ds(i, n), :]

    def hrow(i, n=1):               # (n, TILE) hparam rows, already lane-dense
        return hp_ref[pl.ds(i, n), :]

    def csum(x):                    # sublane sum -> (1, TILE)
        return jnp.sum(x, axis=0, keepdims=True)

    def ftol_lower(value, low):
        # ftol(value, (low, inf), margin=1.0, value_at_margin=0.1): the torch code
        # yields exp(-inf)==0 for value >= low and a gaussian falloff below `low`.
        g = jnp.exp(-0.5 * ((low - value) * _FTOL_SCALE) ** 2)
        return jnp.where(value < low, g, 0.0)

    # hoisted / shared values (few live at a time)
    height_base = srow(ROW_HBASE)                               # (1, T)
    stage2 = (height_base > hrow(HP_STAGE2)).astype(jnp.float32)
    r_base_orient = stage2 * jnp.exp(-2.0 * jnp.sqrt(csum(srow(ROW_ORIENT, 2) ** 2)))
    r_base_angvel = stage2 * jnp.exp(-2.0 * jnp.sqrt(csum(srow(ROW_ANGVEL, 2) ** 2)))

    # ---- task group (eager accumulation) ----
    g_task = None
    g_task = _acc(g_task, W_TASK[0], ftol_lower(srow(ROW_HEAD), 1.0))
    g_task = _acc(g_task, W_TASK[1], r_base_orient)

    # ---- style group ----
    g_style = None
    # [0]/[8] waist: weights -10/+10 cancel exactly -> dropped.
    hip_abs = jnp.abs(srow(ROW_HIP))
    g_style = _acc(g_style, W_STYLE[1],
                   jnp.logical_or(hip_abs > max_hip, hip_abs < min_hip).astype(jnp.float32))
    g_style = _acc(g_style, W_STYLE[2],
                   jnp.logical_or(srow(ROW_SHOULDER_L) < shoulder_max,
                                  srow(ROW_SHOULDER_R) > shoulder_min).astype(jnp.float32))
    dq = srow(ROW_BASE_Q, 2) - srow(ROW_FEET_Q, 2)
    g_style = _acc(g_style, W_STYLE[3],
                   stage2 * jnp.exp(-2.0 * jnp.maximum(csum(dq * dq), 0.3)))

    def ankle_var(base):            # torch.var(dim=-1, unbiased=True), K == 4
        rows = [srow(base + i) for i in range(K)]
        mean = (rows[0] + rows[1] + rows[2] + rows[3]) * (1.0 / K)
        dev = [r - mean for r in rows]
        ss = dev[0] * dev[0] + dev[1] * dev[1] + dev[2] * dev[2] + dev[3] * dev[3]
        return ss * (1.0 / (K - 1))

    g_style = _acc(g_style, W_STYLE[4],
                   (((ankle_var(ROW_LANKLE) + ankle_var(ROW_RANKLE)) * 0.5)
                    < ankle_thres).astype(jnp.float32))
    dfeet = srow(ROW_LFEET_POS, 3) - srow(ROW_RFEET_POS, 3)
    g_style = _acc(g_style, W_STYLE[5],
                   (csum(dfeet * dfeet) > feet_dist_thres).astype(jnp.float32))
    g_style = _acc(g_style, W_STYLE[6],
                   (srow(ROW_FX) > contact_ratio * srow(ROW_FZ)).astype(jnp.float32))
    # [7] shank: weight 0/-25 == -0.0 -> dropped.
    g_style = _acc(g_style, W_STYLE[9], r_base_angvel)

    # ---- regularization group ----
    g_reg = None
    g_reg = _acc(g_reg, W_REG[0], csum(srow(ROW_JACC, D) ** 2))
    # [1]/[2] action_rate / smoothness: past_actions is None in forward() -> exact zero.
    jtorque = srow(ROW_JTORQUE, D)
    jvel = srow(ROW_JVEL, D)
    g_reg = _acc(g_reg, W_REG[3], csum(jtorque * jtorque))
    abs_power = jnp.abs(jtorque * jvel)
    if joint_power_T != 1.0:
        abs_power = abs_power ** joint_power_T
    g_reg = _acc(g_reg, W_REG[4], csum(abs_power))
    g_reg = _acc(g_reg, W_REG[5], csum(jvel * jvel))
    jpos = srow(ROW_JPOS, D)
    dtrack = jpos - hrow(HP_JPOS_PD, D)
    g_reg = _acc(g_reg, W_REG[6], csum(dtrack * dtrack))
    g_reg = _acc(g_reg, W_REG[7],
                 csum(jnp.minimum(jpos - hrow(HP_JPOS_LOW, D), 0.0)
                      + jnp.maximum(jpos - hrow(HP_JPOS_HIGH, D), 0.0)))
    g_reg = _acc(g_reg, W_REG[8],
                 csum(jnp.maximum(jnp.abs(jvel) - hrow(HP_JVEL_LIM, D), 0.0)))

    # ---- post_task group ----
    g_post = None
    g_post = _acc(g_post, W_POST[0], r_base_angvel)
    g_post = _acc(g_post, W_POST[1],
                  stage2 * jnp.exp(-2.0 * jnp.sqrt(csum(srow(ROW_LINVEL, 2) ** 2))))
    g_post = _acc(g_post, W_POST[2], r_base_orient)
    dh = height_base - hrow(HP_HEIGHT_TGT)
    g_post = _acc(g_post, W_POST[3], stage2 * jnp.exp(-20.0 * dh * dh))
    dup = srow(ROW_UPPER, D) - hrow(HP_UPPER_TGT, D)
    g_post = _acc(g_post, W_POST[4], stage2 * csum(dup * dup))
    g_post = _acc(g_post, W_POST[5],
                  stage2 * (-20.0) * jnp.maximum(
                      jnp.abs(srow(ROW_LFEET_H) - srow(ROW_RFEET_H)), feet_par_min))

    # single full-width store (8 sublane rows: 4 groups + 4 zero pad rows)
    zpad = jnp.zeros((OUT_ROWS - NUM_GROUPS,) + g_task.shape[1:], jnp.float32)
    out_ref[...] = jnp.concatenate([g_task, g_style, g_reg, g_post, zpad], axis=0)


# ---------------- tiling & call ----------------
def _choose_tiling(b):
    cdiv = lambda a, d: -(-a // d)
    b128 = cdiv(b, LANES) * LANES
    num_tiles = max(1, cdiv(b128, MAX_LANE_TILE))
    # Keep >=2 grid steps whenever possible so v7x's two TensorCores both get work.
    if num_tiles == 1 and b128 >= 2 * LANES:
        num_tiles = 2
    lane_tile = cdiv(cdiv(b128, num_tiles), LANES) * LANES
    return lane_tile, lane_tile * num_tiles, num_tiles


def _reward_call(st_packed, hp_packed, static_hp):
    """st_packed: (NUM_STATE_ROWS, B) f32, hp_packed: (NUM_HP_ROWS, 1) f32."""
    _, b = st_packed.shape
    lane_tile, b_pad, num_tiles = _choose_tiling(b)
    if b_pad != b:
        st_packed = jnp.pad(st_packed, ((0, 0), (0, b_pad - b)))
    # lane-dense hp block, fetched once (constant index_map)
    hp_wide = jnp.broadcast_to(hp_packed, (NUM_HP_ROWS, lane_tile))

    kernel = partial(_reward_kernel, **static_hp)
    out = pl.pallas_call(
        kernel,
        out_shape=jax.ShapeDtypeStruct((OUT_ROWS, b_pad), jnp.float32),
        grid=(num_tiles,),
        in_specs=[
            pl.BlockSpec((NUM_STATE_ROWS, lane_tile), lambda i: (0, i)),
            pl.BlockSpec((NUM_HP_ROWS, lane_tile), lambda i: (0, 0)),
        ],
        out_specs=pl.BlockSpec((OUT_ROWS, lane_tile), lambda i: (0, i)),
        compiler_params=pltpu.CompilerParams(
            dimension_semantics=("parallel",)),   # v7x: both TCs share the batch
    )(st_packed, hp_wide)
    return out[:NUM_GROUPS]


# ---------------- JAX-side State / HyperParams + glue ----------------
class State(NamedTuple):
    head_height: jax.Array
    angular_velocity: jax.Array
    linear_velocity: jax.Array
    orientation: jax.Array
    projected_gravity_vector: jax.Array
    joint_velocity: jax.Array
    joint_acceleration: jax.Array
    joint_torque: jax.Array
    joint_position: jax.Array
    left_ankle_keypoint_z: jax.Array
    right_ankle_keypoint_z: jax.Array
    left_feet_height: jax.Array
    right_feet_height: jax.Array
    left_shank_angle: jax.Array
    right_shank_angle: jax.Array
    left_feet_pos: jax.Array
    right_feet_pos: jax.Array
    upper_body_posture: jax.Array
    height_base: jax.Array
    contact_force: jax.Array
    hip_joint_angle_lr: jax.Array
    robot_base_angle_q: jax.Array
    feet_angle_q: jax.Array
    knee_joint_angle_lr: jax.Array
    shoulder_joint_angle_l: jax.Array
    shoulder_joint_angle_r: jax.Array
    waist_yaw_joint_angle: jax.Array


class HyperParams(NamedTuple):
    height_stage1_thres: jax.Array
    height_stage2_thres: jax.Array
    joint_velocity_abs_limit: jax.Array
    joint_position_PD_target: jax.Array
    joint_position_lower_limit: jax.Array
    joint_position_higher_limit: jax.Array
    upper_body_posture_target: jax.Array
    height_base_target: jax.Array
    ankle_parallel_thres: float = 0.05
    joint_power_T: float = 1.0
    feet_parallel_min_height_diff: float = 0.02
    feet_distance_thres: float = 0.9
    waist_yaw_joint_angle_thres: float = 1.4
    contact_force_ratio_is_foot_stumble: float = 3.0
    max_hip_joint_angle_lr: float = 1.4
    min_hip_joint_angle_lr: float = 0.9
    knee_joint_angle_max_min: Tuple[float, float] = (2.85, -0.06)
    shoulder_joint_angle_max_min: Tuple[float, float] = (-0.02, 0.02)


def _pack_state(state: State):
    """Pack a single or leading-batch State directly into (NUM_STATE_ROWS, B) f32."""
    head = jnp.asarray(state.head_height, jnp.float32)
    bsz = head.shape[0] if head.ndim >= 1 else 1

    def f(x, n):                                # (n, B) row-band piece
        return jnp.asarray(x, jnp.float32).reshape(bsz, n).T

    def z(n):
        return jnp.zeros((n, bsz), jnp.float32)

    cf = f(state.contact_force, 3)
    parts = [
        f(state.head_height, 1),                 # ROW_HEAD
        f(state.height_base, 1),                 # ROW_HBASE
        cf[0:1],                                 # ROW_FX  (contact_force[:-2])
        cf[2:3],                                 # ROW_FZ  (contact_force[-1])
        f(state.left_feet_height, 1),            # ROW_LFEET_H
        f(state.right_feet_height, 1),           # ROW_RFEET_H
        f(state.hip_joint_angle_lr, 1),          # ROW_HIP
        f(state.waist_yaw_joint_angle, 1),       # ROW_WAIST (unused by kernel)
        f(state.shoulder_joint_angle_l, 1),      # ROW_SHOULDER_L
        f(state.shoulder_joint_angle_r, 1),      # ROW_SHOULDER_R
        f(state.angular_velocity, 3)[:2],        # ROW_ANGVEL
        f(state.linear_velocity, 3)[:2],         # ROW_LINVEL
        f(state.orientation, 3)[:2],             # ROW_ORIENT
        f(state.robot_base_angle_q, 3)[:2],      # ROW_BASE_Q
        f(state.feet_angle_q, 3)[:2],            # ROW_FEET_Q
        f(state.left_ankle_keypoint_z, K),       # ROW_LANKLE
        f(state.right_ankle_keypoint_z, K),      # ROW_RANKLE
        f(state.left_feet_pos, 3),               # ROW_LFEET_POS
        z(1),                                    # pad to 8-row band
        f(state.right_feet_pos, 3),              # ROW_RFEET_POS
        z(5),                                    # pad to 8-row band
        f(state.joint_velocity, D),              # ROW_JVEL
        f(state.joint_acceleration, D),          # ROW_JACC
        f(state.joint_torque, D),                # ROW_JTORQUE
        f(state.joint_position, D),              # ROW_JPOS
        f(state.upper_body_posture, D),          # ROW_UPPER
    ]
    return jnp.concatenate(parts, axis=0), bsz   # (NUM_STATE_ROWS, B)


def _pack_hparams(hp: HyperParams):
    def v(x, n):
        return jnp.asarray(x, jnp.float32).reshape(n, 1)
    return jnp.concatenate([
        v(hp.joint_velocity_abs_limit, D),       # HP_JVEL_LIM
        v(hp.joint_position_PD_target, D),       # HP_JPOS_PD
        v(hp.joint_position_lower_limit, D),     # HP_JPOS_LOW
        v(hp.joint_position_higher_limit, D),    # HP_JPOS_HIGH
        v(hp.upper_body_posture_target, D),      # HP_UPPER_TGT
        v(hp.height_stage2_thres, 1),            # HP_STAGE2
        v(hp.height_base_target, 1),             # HP_HEIGHT_TGT
        jnp.zeros((NUM_HP_ROWS - 42, 1), jnp.float32),   # pad to 48 rows
    ], axis=0)                                   # (NUM_HP_ROWS, 1)


def _static_hparams(hp: HyperParams):
    smax, smin = hp.shoulder_joint_angle_max_min
    return dict(
        joint_power_T=float(hp.joint_power_T),
        ankle_thres=float(hp.ankle_parallel_thres),
        feet_par_min=float(hp.feet_parallel_min_height_diff),
        feet_dist_thres=float(hp.feet_distance_thres),
        contact_ratio=float(hp.contact_force_ratio_is_foot_stumble),
        max_hip=float(hp.max_hip_joint_angle_lr),
        min_hip=float(hp.min_hip_joint_angle_lr),
        shoulder_max=float(smax),
        shoulder_min=float(smin),
    )


def reward_shaping_forward(state: State, hp: HyperParams) -> jax.Array:
    """RewardShapingWrapper.forward(state) for a single State -> (4,) group rewards."""
    st, _ = _pack_state(state)
    out = _reward_call(st, _pack_hparams(hp), _static_hparams(hp))
    return out[:, 0]


def reward_shaping_forward_batched(state: State, hp: HyperParams) -> jax.Array:
    """Batched variant: every State field has a leading batch dim B -> (B, 4)."""
    st, bsz = _pack_state(state)
    out = _reward_call(st, _pack_hparams(hp), _static_hparams(hp))
    return out[:, :bsz].T


# ---------------- plain-JAX reference (mirrors the torch math exactly) ----------------
def reward_shaping_reference(state: State, hp: HyperParams) -> jax.Array:
    def norm(x):
        return jnp.sqrt(jnp.sum(x * x))

    def ftol_lower(v, low):
        g = jnp.exp(-0.5 * ((low - v) * _FTOL_SCALE) ** 2)
        return jnp.where(v < low, g, 0.0)

    smax, smin = hp.shoulder_joint_angle_max_min
    stage1 = (state.height_base > hp.height_stage1_thres).astype(jnp.float32)
    stage2 = (state.height_base > hp.height_stage2_thres).astype(jnp.float32)

    r = []
    # task
    r.append(ftol_lower(state.head_height, 1.0))
    r_base_orient = stage2 * jnp.exp(-2.0 * norm(state.orientation[:2]))
    r.append(r_base_orient)
    # style
    r_waist = (state.waist_yaw_joint_angle > hp.waist_yaw_joint_angle_thres
               ).astype(jnp.float32)
    r.append(r_waist)
    hip_abs = jnp.abs(state.hip_joint_angle_lr)
    r.append(jnp.logical_or(hip_abs > hp.max_hip_joint_angle_lr,
                            hip_abs < hp.min_hip_joint_angle_lr).astype(jnp.float32))
    r.append(jnp.logical_or(state.shoulder_joint_angle_l < smax,
                            state.shoulder_joint_angle_r > smin).astype(jnp.float32))
    dq = state.robot_base_angle_q[:2] - state.feet_angle_q[:2]
    r.append(stage2 * jnp.exp(-2.0 * jnp.maximum(jnp.sum(dq * dq), 0.3)))
    var_l = jnp.var(state.left_ankle_keypoint_z, ddof=1)
    var_r = jnp.var(state.right_ankle_keypoint_z, ddof=1)
    r.append(((var_l + var_r) * 0.5 < hp.ankle_parallel_thres).astype(jnp.float32))
    dfeet = state.left_feet_pos - state.right_feet_pos
    r.append((jnp.sum(dfeet * dfeet) > hp.feet_distance_thres).astype(jnp.float32))
    fxy, fz = state.contact_force[:-2], state.contact_force[-1]
    r.append(jnp.any(fxy > hp.contact_force_ratio_is_foot_stumble * fz
                     ).astype(jnp.float32))
    theta = (state.left_shank_angle + state.right_shank_angle) * 0.5
    r.append(ftol_lower(theta, 0.8) * stage1)
    r.append(r_waist)
    r_base_angvel = stage2 * jnp.exp(-2.0 * norm(state.angular_velocity[:2]))
    r.append(r_base_angvel)
    # regularization
    r.append(jnp.sum(state.joint_acceleration ** 2))
    r.append(jnp.float32(0.0))   # reward_action_rate (past_actions is None)
    r.append(jnp.float32(0.0))   # reward_smoothness  (past_actions is None)
    r.append(jnp.sum(state.joint_torque ** 2))
    r.append(jnp.sum(jnp.abs(state.joint_torque * state.joint_velocity)
                     ** hp.joint_power_T))
    r.append(jnp.sum(state.joint_velocity ** 2))
    r.append(jnp.sum((state.joint_position - hp.joint_position_PD_target) ** 2))
    pos = state.joint_position
    r.append(jnp.sum(jnp.minimum(pos - hp.joint_position_lower_limit, 0.0)
                     + jnp.maximum(pos - hp.joint_position_higher_limit, 0.0)))
    r.append(jnp.sum(jnp.maximum(jnp.abs(state.joint_velocity)
                                 - hp.joint_velocity_abs_limit, 0.0)))
    # post_task
    r.append(r_base_angvel)
    r.append(stage2 * jnp.exp(-2.0 * norm(state.linear_velocity[:2])))
    r.append(r_base_orient)
    r.append(stage2 * jnp.exp(-20.0 * (state.height_base - hp.height_base_target) ** 2))
    r.append(stage2 * jnp.sum((state.upper_body_posture
                               - hp.upper_body_posture_target) ** 2))
    r.append(stage2 * jnp.maximum(jnp.abs(state.left_feet_height
                                          - state.right_feet_height),
                                  hp.feet_parallel_min_height_diff) * (-20.0))

    rewards = jnp.stack([jnp.asarray(x, jnp.float32).reshape(()) for x in r])
    weights = jnp.asarray(W_TASK + W_STYLE + W_REG + W_POST, jnp.float32)
    weighted = rewards * weights
    sizes = (len(W_TASK), len(W_STYLE), len(W_REG), len(W_POST))
    outs, idx = [], 0
    for n in sizes:
        outs.append(jnp.sum(weighted[idx:idx + n]))
        idx += n
    return jnp.stack(outs)


# ---------------- main ----------------
def make_state(key, prefix=()):
    ks = jax.random.split(key, 32)

    def u(k, shape=(), lo=-1.0, hi=1.0):
        return jax.random.uniform(k, prefix + shape, jnp.float32, lo, hi)

    return State(
        head_height=u(ks[0], (), 0.5, 1.5),
        angular_velocity=u(ks[1], (3,)),
        linear_velocity=u(ks[2], (3,)),
        orientation=u(ks[3], (3,)),
        projected_gravity_vector=u(ks[4], ()),
        joint_velocity=u(ks[5], (D,), -2.0, 2.0),
        joint_acceleration=u(ks[6], (D,), -5.0, 5.0),
        joint_torque=u(ks[7], (D,), -3.0, 3.0),
        joint_position=u(ks[8], (D,), -1.0, 1.0),
        left_ankle_keypoint_z=u(ks[9], (K,), 0.0, 0.2),
        right_ankle_keypoint_z=u(ks[10], (K,), 0.0, 0.2),
        left_feet_height=u(ks[11], (), 0.0, 0.1),
        right_feet_height=u(ks[12], (), 0.0, 0.1),
        left_shank_angle=u(ks[13], (), 0.0, 1.5),
        right_shank_angle=u(ks[14], (), 0.0, 1.5),
        left_feet_pos=u(ks[15], (3,)),
        right_feet_pos=u(ks[16], (3,)),
        upper_body_posture=u(ks[17], (D,)),
        height_base=u(ks[18], (), 0.5, 1.0),
        contact_force=u(ks[19], (3,), 0.0, 10.0),
        hip_joint_angle_lr=u(ks[20], (), 0.0, 2.0),
        robot_base_angle_q=u(ks[21], (3,)),
        feet_angle_q=u(ks[22], (3,)),
        knee_joint_angle_lr=u(ks[23], (2,)),
        shoulder_joint_angle_l=u(ks[24], (), -0.1, 0.1),
        shoulder_joint_angle_r=u(ks[25], (), -0.1, 0.1),
        waist_yaw_joint_angle=u(ks[26], (), 0.0, 2.0),
    )


if __name__ == "__main__":
    key = jax.random.PRNGKey(0)
    k_state, k_hp1, k_hp2, k_batch = jax.random.split(key, 4)

    hp = HyperParams(
        height_stage1_thres=jnp.float32(0.45),
        height_stage2_thres=jnp.float32(0.65),
        joint_velocity_abs_limit=jnp.full((D,), 1.5, jnp.float32),
        joint_position_PD_target=jax.random.uniform(k_hp1, (D,), jnp.float32, -0.2, 0.2),
        joint_position_lower_limit=jnp.full((D,), -1.2, jnp.float32),
        joint_position_higher_limit=jnp.full((D,), 1.2, jnp.float32),
        upper_body_posture_target=jax.random.uniform(k_hp2, (D,), jnp.float32, -0.2, 0.2),
        height_base_target=jnp.float32(0.95),
    )

    # --- single-state forward (matches the torch module's forward signature) ---
    state = make_state(k_state)
    out = reward_shaping_forward(state, hp)
    out = jax.block_until_ready(out)
    ref = reward_shaping_reference(state, hp)
    np.testing.assert_allclose(np.asarray(out), np.asarray(ref),
                               rtol=2e-3, atol=1e-4)

    # --- batched forward: envs on lanes, 2 grid steps (exercises the tiled path) ---
    B = 300
    state_b = make_state(k_batch, (B,))
    out_b = reward_shaping_forward_batched(state_b, hp)
    out_b = jax.block_until_ready(out_b)
    ref_b = jax.vmap(lambda s: reward_shaping_reference(s, hp))(state_b)
    np.testing.assert_allclose(np.asarray(out_b), np.asarray(ref_b),
                               rtol=2e-3, atol=1e-4)

    print("KERNEL_OK")
</pallas_src>

<mosaic_0001>
module attributes {stable_mosaic.version = 11 : i64} {
  func.func @_reward_kernel(%arg0: i32, %arg1: memref<80x128xf32, #tpu.memory_space<vmem>>, %arg2: memref<48x128xf32, #tpu.memory_space<vmem>>, %arg3: memref<8x128xf32, #tpu.memory_space<vmem>>) attributes {dimension_semantics = [#tpu.dimension_semantics<parallel>], iteration_bounds = array<i64: 1>, scalar_prefetch = 0 : i64, scratch_operands = 0 : i64, tpu.core_type = #tpu.core_type<tc>, window_params = [{transform_indices = @transform_0, window_bounds = array<i64: 80, 128>}, {pipeline_mode = #tpu.pipeline_mode<synchronous>, transform_indices = @transform_1, window_bounds = array<i64: 48, 128>}, {transform_indices = @transform_2, window_bounds = array<i64: 8, 128>}]} {
    %c1 = arith.constant 1 : index
    %c0 = arith.constant 0 : index
    %0 = vector.load %arg1[%c1, %c0] : memref<80x128xf32, #tpu.memory_space<vmem>>, vector<1x128xf32>
    %c40 = arith.constant 40 : index
    %c0_0 = arith.constant 0 : index
    %1 = vector.load %arg2[%c40, %c0_0] : memref<48x128xf32, #tpu.memory_space<vmem>>, vector<1x128xf32>
    %2 = arith.cmpf ogt, %0, %1 : vector<1x128xf32>
    %3 = arith.extui %2 : vector<1x128xi1> to vector<1x128xi32>
    %4 = arith.sitofp %3 : vector<1x128xi32> to vector<1x128xf32>
    %c14 = arith.constant 14 : index
    %c0_1 = arith.constant 0 : index
    %5 = vector.load %arg1[%c14, %c0_1] : memref<80x128xf32, #tpu.memory_space<vmem>>, vector<2x128xf32>
    %6 = arith.mulf %5, %5 : vector<2x128xf32>
    %cst = arith.constant dense<0.000000e+00> : vector<128xf32>
    %7 = vector.multi_reduction <add>, %6, %cst [0] : vector<2x128xf32> to vector<128xf32>
    %8 = vector.shape_cast %7 : vector<128xf32> to vector<1x128xf32>
    %9 = math.sqrt %8 : vector<1x128xf32>
    %cst_2 = arith.constant -2.000000e+00 : f32
    %10 = vector.broadcast %cst_2 : f32 to vector<1x128xf32>
    %11 = arith.mulf %10, %9 : vector<1x128xf32>
    %12 = math.exp %11 : vector<1x128xf32>
    %13 = arith.mulf %4, %12 : vector<1x128xf32>
    %c10 = arith.constant 10 : index
    %c0_3 = arith.constant 0 : index
    %14 = vector.load %arg1[%c10, %c0_3] : memref<80x128xf32, #tpu.memory_space<vmem>>, vector<2x128xf32>
    %15 = arith.mulf %14, %14 : vector<2x128xf32>
    %cst_4 = arith.constant dense<0.000000e+00> : vector<128xf32>
    %16 = vector.multi_reduction <add>, %15, %cst_4 [0] : vector<2x128xf32> to vector<128xf32>
    %17 = vector.shape_cast %16 : vector<128xf32> to vector<1x128xf32>
    %18 = math.sqrt %17 : vector<1x128xf32>
    %cst_5 = arith.constant -2.000000e+00 : f32
    %19 = vector.broadcast %cst_5 : f32 to vector<1x128xf32>
    %20 = arith.mulf %19, %18 : vector<1x128xf32>
    %21 = math.exp %20 : vector<1x128xf32>
    %22 = arith.mulf %4, %21 : vector<1x128xf32>
    %c0_6 = arith.constant 0 : index
    %c0_7 = arith.constant 0 : index
    %23 = vector.load %arg1[%c0_6, %c0_7] : memref<80x128xf32, #tpu.memory_space<vmem>>, vector<1x128xf32>
    %cst_8 = arith.constant 1.000000e+00 : f32
    %24 = vector.broadcast %cst_8 : f32 to vector<1x128xf32>
    %25 = arith.subf %24, %23 : vector<1x128xf32>
    %cst_9 = arith.constant 2.14596605 : f32
    %26 = vector.broadcast %cst_9 : f32 to vector<1x128xf32>
    %27 = arith.mulf %25, %26 : vector<1x128xf32>
    %28 = arith.mulf %27, %27 : vector<1x128xf32>
    %cst_10 = arith.constant -5.000000e-01 : f32
    %29 = vector.broadcast %cst_10 : f32 to vector<1x128xf32>
    %30 = arith.mulf %29, %28 : vector<1x128xf32>
    %31 = math.exp %30 : vector<1x128xf32>
    %cst_11 = arith.constant 1.000000e+00 : f32
    %32 = vector.broadcast %cst_11 : f32 to vector<1x128xf32>
    %33 = arith.cmpf olt, %23, %32 : vector<1x128xf32>
    %cst_12 = arith.constant 0.000000e+00 : f32
    %34 = vector.broadcast %cst_12 : f32 to vector<1x128xf32>
    %35 = arith.select %33, %31, %34 : vector<1x128xi1>, vector<1x128xf32>
    %36 = arith.addf %35, %13 : vector<1x128xf32>
    %c6 = arith.constant 6 : index
    %c0_13 = arith.constant 0 : index
    %37 = vector.load %arg1[%c6, %c0_13] : memref<80x128xf32, #tpu.memory_space<vmem>>, vector<1x128xf32>
    %38 = math.absf %37 : vector<1x128xf32>
    %cst_14 = arith.constant 1.400000e+00 : f32
    %39 = vector.broadcast %cst_14 : f32 to vector<1x128xf32>
    %40 = arith.cmpf ogt, %38, %39 : vector<1x128xf32>
    %cst_15 = arith.constant 0.899999976 : f32
    %41 = vector.broadcast %cst_15 : f32 to vector<1x128xf32>
    %42 = arith.cmpf olt, %38, %41 : vector<1x128xf32>
    %43 = arith.ori %40, %42 : vector<1x128xi1>
    %44 = arith.extui %43 : vector<1x128xi1> to vector<1x128xi32>
    %45 = arith.sitofp %44 : vector<1x128xi32> to vector<1x128xf32>
    %cst_16 = arith.constant -1.000000e+00 : f32
    %46 = vector.broadcast %cst_16 : f32 to vector<1x128xf32>
    %47 = arith.mulf %46, %45 : vector<1x128xf32>
    %c8 = arith.constant 8 : index
    %c0_17 = arith.constant 0 : index
    %48 = vector.load %arg1[%c8, %c0_17] : memref<80x128xf32, #tpu.memory_space<vmem>>, vector<1x128xf32>
    %cst_18 = arith.constant -2.000000e-02 : f32
    %49 = vector.broadcast %cst_18 : f32 to vector<1x128xf32>
    %50 = arith.cmpf olt, %48, %49 : vector<1x128xf32>
    %c9 = arith.constant 9 : index
    %c0_19 = arith.constant 0 : index
    %51 = vector.load %arg1[%c9, %c0_19] : memref<80x128xf32, #tpu.memory_space<vmem>>, vector<1x128xf32>
    %cst_20 = arith.constant 2.000000e-02 : f32
    %52 = vector.broadcast %cst_20 : f32 to vector<1x128xf32>
    %53 = arith.cmpf ogt, %51, %52 : vector<1x128xf32>
    %54 = arith.ori %50, %53 : vector<1x128xi1>
    %55 = arith.extui %54 : vector<1x128xi1> to vector<1x128xi32>
    %56 = arith.sitofp %55 : vector<1x128xi32> to vector<1x128xf32>
    %cst_21 = arith.constant 2.500000e-02 : f32
    %57 = vector.broadcast %cst_21 : f32 to vector<1x128xf32>
    %58 = arith.mulf %57, %56 : vector<1x128xf32>
    %59 = arith.addf %47, %58 : vector<1x128xf32>
    %c16 = arith.constant 16 : index
    %c0_22 = arith.constant 0 : index
    %60 = vector.load %arg1[%c16, %c0_22] : memref<80x128xf32, #tpu.memory_space<vmem>>, vector<2x128xf32>
    %c18 = arith.constant 18 : index
    %c0_23 = arith.constant 0 : index
    %61 = vector.load %arg1[%c18, %c0_23] : memref<80x128xf32, #tpu.memory_space<vmem>>, vector<2x128xf32>
    %62 = arith.subf %60, %61 : vector<2x128xf32>
    %63 = arith.mulf %62, %62 : vector<2x128xf32>
    %cst_24 = arith.constant dense<0.000000e+00> : vector<128xf32>
    %64 = vector.multi_reduction <add>, %63, %cst_24 [0] : vector<2x128xf32> to vector<128xf32>
    %65 = vector.shape_cast %64 : vector<128xf32> to vector<1x128xf32>
    %cst_25 = arith.constant 3.000000e-01 : f32
    %66 = vector.broadcast %cst_25 : f32 to vector<1x128xf32>
    %67 = arith.maximumf %65, %66 : vector<1x128xf32>
    %cst_26 = arith.constant -2.000000e+00 : f32
    %68 = vector.broadcast %cst_26 : f32 to vector<1x128xf32>
    %69 = arith.mulf %68, %67 : vector<1x128xf32>
    %70 = math.exp %69 : vector<1x128xf32>
    %71 = arith.mulf %4, %70 : vector<1x128xf32>
    %cst_27 = arith.constant -2.500000e+00 : f32
    %72 = vector.broadcast %cst_27 : f32 to vector<1x128xf32>
    %73 = arith.mulf %72, %71 : vector<1x128xf32>
    %74 = arith.addf %59, %73 : vector<1x128xf32>
    %c20 = arith.constant 20 : index
    %c0_28 = arith.constant 0 : index
    %75 = vector.load %arg1[%c20, %c0_28] : memref<80x128xf32, #tpu.memory_space<vmem>>, vector<1x128xf32>
    %c21 = arith.constant 21 : index
    %c0_29 = arith.constant 0 : index
    %76 = vector.load %arg1[%c21, %c0_29] : memref<80x128xf32, #tpu.memory_space<vmem>>, vector<1x128xf32>
    %c22 = arith.constant 22 : index
    %c0_30 = arith.constant 0 : index
    %77 = vector.load %arg1[%c22, %c0_30] : memref<80x128xf32, #tpu.memory_space<vmem>>, vector<1x128xf32>
    %c23 = arith.constant 23 : index
    %c0_31 = arith.constant 0 : index
    %78 = vector.load %arg1[%c23, %c0_31] : memref<80x128xf32, #tpu.memory_space<vmem>>, vector<1x128xf32>
    %79 = arith.addf %75, %76 : vector<1x128xf32>
    %80 = arith.addf %79, %77 : vector<1x128xf32>
    %81 = arith.addf %80, %78 : vector<1x128xf32>
    %cst_32 = arith.constant 2.500000e-01 : f32
    %82 = vector.broadcast %cst_32 : f32 to vector<1x128xf32>
    %83 = arith.mulf %81, %82 : vector<1x128xf32>
    %84 = arith.subf %75, %83 : vector<1x128xf32>
    %85 = arith.subf %76, %83 : vector<1x128xf32>
    %86 = arith.subf %77, %83 : vector<1x128xf32>
    %87 = arith.subf %78, %83 : vector<1x128xf32>
    %88 = arith.mulf %84, %84 : vector<1x128xf32>
    %89 = arith.mulf %85, %85 : vector<1x128xf32>
    %90 = arith.addf %88, %89 : vector<1x128xf32>
    %91 = arith.mulf %86, %86 : vector<1x128xf32>
    %92 = arith.addf %90, %91 : vector<1x128xf32>
    %93 = arith.mulf %87, %87 : vector<1x128xf32>
    %94 = arith.addf %92, %93 : vector<1x128xf32>
    %cst_33 = arith.constant 0.333333343 : f32
    %95 = vector.broadcast %cst_33 : f32 to vector<1x128xf32>
    %96 = arith.mulf %94, %95 : vector<1x128xf32>
    %c24 = arith.constant 24 : index
    %c0_34 = arith.constant 0 : index
    %97 = vector.load %arg1[%c24, %c0_34] : memref<80x128xf32, #tpu.memory_space<vmem>>, vector<1x128xf32>
    %c25 = arith.constant 25 : index
    %c0_35 = arith.constant 0 : index
    %98 = vector.load %arg1[%c25, %c0_35] : memref<80x128xf32, #tpu.memory_space<vmem>>, vector<1x128xf32>
    %c26 = arith.constant 26 : index
    %c0_36 = arith.constant 0 : index
    %99 = vector.load %arg1[%c26, %c0_36] : memref<80x128xf32, #tpu.memory_space<vmem>>, vector<1x128xf32>
    %c27 = arith.constant 27 : index
    %c0_37 = arith.constant 0 : index
    %100 = vector.load %arg1[%c27, %c0_37] : memref<80x128xf32, #tpu.memory_space<vmem>>, vector<1x128xf32>
    %101 = arith.addf %97, %98 : vector<1x128xf32>
    %102 = arith.addf %101, %99 : vector<1x128xf32>
    %103 = arith.addf %102, %100 : vector<1x128xf32>
    %cst_38 = arith.constant 2.500000e-01 : f32
    %104 = vector.broadcast %cst_38 : f32 to vector<1x128xf32>
    %105 = arith.mulf %103, %104 : vector<1x128xf32>
    %106 = arith.subf %97, %105 : vector<1x128xf32>
    %107 = arith.subf %98, %105 : vector<1x128xf32>
    %108 = arith.subf %99, %105 : vector<1x128xf32>
    %109 = arith.subf %100, %105 : vector<1x128xf32>
    %110 = arith.mulf %106, %106 : vector<1x128xf32>
    %111 = arith.mulf %107, %107 : vector<1x128xf32>
    %112 = arith.addf %110, %111 : vector<1x128xf32>
    %113 = arith.mulf %108, %108 : vector<1x128xf32>
    %114 = arith.addf %112, %113 : vector<1x128xf32>
    %115 = arith.mulf %109, %109 : vector<1x128xf32>
    %116 = arith.addf %114, %115 : vector<1x128xf32>
    %cst_39 = arith.constant 0.333333343 : f32
    %117 = vector.broadcast %cst_39 : f32 to vector<1x128xf32>
    %118 = arith.mulf %116, %117 : vector<1x128xf32>
    %119 = arith.addf %96, %118 : vector<1x128xf32>
    %cst_40 = arith.constant 5.000000e-01 : f32
    %120 = vector.broadcast %cst_40 : f32 to vector<1x128xf32>
    %121 = arith.mulf %119, %120 : vector<1x128xf32>
    %cst_41 = arith.constant 5.000000e-02 : f32
    %122 = vector.broadcast %cst_41 : f32 to vector<1x128xf32>
    %123 = arith.cmpf olt, %121, %122 : vector<1x128xf32>
    %124 = arith.extui %123 : vector<1x128xi1> to vector<1x128xi32>
    %125 = arith.sitofp %124 : vector<1x128xi32> to vector<1x128xf32>
    %126 = arith.addf %74, %125 : vector<1x128xf32>
    %c28 = arith.constant 28 : index
    %c0_42 = arith.constant 0 : index
    %127 = vector.load %arg1[%c28, %c0_42] : memref<80x128xf32, #tpu.memory_space<vmem>>, vector<3x128xf32>
    %c32 = arith.constant 32 : index
    %c0_43 = arith.constant 0 : index
    %128 = vector.load %arg1[%c32, %c0_43] : memref<80x128xf32, #tpu.memory_space<vmem>>, vector<3x128xf32>
    %129 = arith.subf %127, %128 : vector<3x128xf32>
    %130 = arith.mulf %129, %129 : vector<3x128xf32>
    %cst_44 = arith.constant dense<0.000000e+00> : vector<128xf32>
    %131 = vector.multi_reduction <add>, %130, %cst_44 [0] : vector<3x128xf32> to vector<128xf32>
    %132 = vector.shape_cast %131 : vector<128xf32> to vector<1x128xf32>
    %cst_45 = arith.constant 0.899999976 : f32
    %133 = vector.broadcast %cst_45 : f32 to vector<1x128xf32>
    %134 = arith.cmpf ogt, %132, %133 : vector<1x128xf32>
    %135 = arith.extui %134 : vector<1x128xi1> to vector<1x128xi32>
    %136 = arith.sitofp %135 : vector<1x128xi32> to vector<1x128xf32>
    %cst_46 = arith.constant 2.000000e+01 : f32
    %137 = vector.broadcast %cst_46 : f32 to vector<1x128xf32>
    %138 = arith.mulf %137, %136 : vector<1x128xf32>
    %139 = arith.addf %126, %138 : vector<1x128xf32>
    %c2 = arith.constant 2 : index
    %c0_47 = arith.constant 0 : index
    %140 = vector.load %arg1[%c2, %c0_47] : memref<80x128xf32, #tpu.memory_space<vmem>>, vector<1x128xf32>
    %c3 = arith.constant 3 : index
    %c0_48 = arith.constant 0 : index
    %141 = vector.load %arg1[%c3, %c0_48] : memref<80x128xf32, #tpu.memory_space<vmem>>, vector<1x128xf32>
    %cst_49 = arith.constant 3.000000e+00 : f32
    %142 = vector.broadcast %cst_49 : f32 to vector<1x128xf32>
    %143 = arith.mulf %142, %141 : vector<1x128xf32>
    %144 = arith.cmpf ogt, %140, %143 : vector<1x128xf32>
    %145 = arith.extui %144 : vector<1x128xi1> to vector<1x128xi32>
    %146 = arith.sitofp %145 : vector<1x128xi32> to vector<1x128xf32>
    %cst_50 = arith.constant -1.000000e+01 : f32
    %147 = vector.broadcast %cst_50 : f32 to vector<1x128xf32>
    %148 = arith.mulf %147, %146 : vector<1x128xf32>
    %149 = arith.addf %139, %148 : vector<1x128xf32>
    %150 = arith.addf %149, %22 : vector<1x128xf32>
    %c48 = arith.constant 48 : index
    %c0_51 = arith.constant 0 : index
    %151 = vector.load %arg1[%c48, %c0_51] : memref<80x128xf32, #tpu.memory_space<vmem>>, vector<8x128xf32>
    %152 = arith.mulf %151, %151 : vector<8x128xf32>
    %cst_52 = arith.constant dense<0.000000e+00> : vector<128xf32>
    %153 = vector.multi_reduction <add>, %152, %cst_52 [0] : vector<8x128xf32> to vector<128xf32>
    %154 = vector.shape_cast %153 : vector<128xf32> to vector<1x128xf32>
    %cst_53 = arith.constant -2.500000e-07 : f32
    %155 = vector.broadcast %cst_53 : f32 to vector<1x128xf32>
    %156 = arith.mulf %155, %154 : vector<1x128xf32>
    %c56 = arith.constant 56 : index
    %c0_54 = arith.constant 0 : index
    %157 = vector.load %arg1[%c56, %c0_54] : memref<80x128xf32, #tpu.memory_space<vmem>>, vector<8x128xf32>
    %c40_55 = arith.constant 40 : index
    %c0_56 = arith.constant 0 : index
    %158 = vector.load %arg1[%c40_55, %c0_56] : memref<80x128xf32, #tpu.memory_space<vmem>>, vector<8x128xf32>
    %159 = arith.mulf %157, %157 : vector<8x128xf32>
    %cst_57 = arith.constant dense<0.000000e+00> : vector<128xf32>
    %160 = vector.multi_reduction <add>, %159, %cst_57 [0] : vector<8x128xf32> to vector<128xf32>
    %161 = vector.shape_cast %160 : vector<128xf32> to vector<1x128xf32>
    %cst_58 = arith.constant -2.500000e-06 : f32
    %162 = vector.broadcast %cst_58 : f32 to vector<1x128xf32>
    %163 = arith.mulf %162, %161 : vector<1x128xf32>
    %164 = arith.addf %156, %163 : vector<1x128xf32>
    %165 = arith.mulf %157, %158 : vector<8x128xf32>
    %166 = math.absf %165 : vector<8x128xf32>
    %cst_59 = arith.constant dense<0.000000e+00> : vector<128xf32>
    %167 = vector.multi_reduction <add>, %166, %cst_59 [0] : vector<8x128xf32> to vector<128xf32>
    %168 = vector.shape_cast %167 : vector<128xf32> to vector<1x128xf32>
    %cst_60 = arith.constant -2.500000e-05 : f32
    %169 = vector.broadcast %cst_60 : f32 to vector<1x128xf32>
    %170 = arith.mulf %169, %168 : vector<1x128xf32>
    %171 = arith.addf %164, %170 : vector<1x128xf32>
    %172 = arith.mulf %158, %158 : vector<8x128xf32>
    %cst_61 = arith.constant dense<0.000000e+00> : vector<128xf32>
    %173 = vector.multi_reduction <add>, %172, %cst_61 [0] : vector<8x128xf32> to vector<128xf32>
    %174 = vector.shape_cast %173 : vector<128xf32> to vector<1x128xf32>
    %cst_62 = arith.constant -9.99999974E-5 : f32
    %175 = vector.broadcast %cst_62 : f32 to vector<1x128xf32>
    %176 = arith.mulf %175, %174 : vector<1x128xf32>
    %177 = arith.addf %171, %176 : vector<1x128xf32>
    %c64 = arith.constant 64 : index
    %c0_63 = arith.constant 0 : index
    %178 = vector.load %arg1[%c64, %c0_63] : memref<80x128xf32, #tpu.memory_space<vmem>>, vector<8x128xf32>
    %c8_64 = arith.constant 8 : index
    %c0_65 = arith.constant 0 : index
    %179 = vector.load %arg2[%c8_64, %c0_65] : memref<48x128xf32, #tpu.memory_space<vmem>>, vector<8x128xf32>
    %180 = arith.subf %178, %179 : vector<8x128xf32>
    %181 = arith.mulf %180, %180 : vector<8x128xf32>
    %cst_66 = arith.constant dense<0.000000e+00> : vector<128xf32>
    %182 = vector.multi_reduction <add>, %181, %cst_66 [0] : vector<8x128xf32> to vector<128xf32>
    %183 = vector.shape_cast %182 : vector<128xf32> to vector<1x128xf32>
    %cst_67 = arith.constant -2.500000e-01 : f32
    %184 = vector.broadcast %cst_67 : f32 to vector<1x128xf32>
    %185 = arith.mulf %184, %183 : vector<1x128xf32>
    %186 = arith.addf %177, %185 : vector<1x128xf32>
    %c16_68 = arith.constant 16 : index
    %c0_69 = arith.constant 0 : index
    %187 = vector.load %arg2[%c16_68, %c0_69] : memref<48x128xf32, #tpu.memory_space<vmem>>, vector<8x128xf32>
    %188 = arith.subf %178, %187 : vector<8x128xf32>
    %cst_70 = arith.constant 0.000000e+00 : f32
    %189 = vector.broadcast %cst_70 : f32 to vector<8x128xf32>
    %190 = arith.minimumf %188, %189 : vector<8x128xf32>
    %c24_71 = arith.constant 24 : index
    %c0_72 = arith.constant 0 : index
    %191 = vector.load %arg2[%c24_71, %c0_72] : memref<48x128xf32, #tpu.memory_space<vmem>>, vector<8x128xf32>
    %192 = arith.subf %178, %191 : vector<8x128xf32>
    %cst_73 = arith.constant 0.000000e+00 : f32
    %193 = vector.broadcast %cst_73 : f32 to vector<8x128xf32>
    %194 = arith.maximumf %192, %193 : vector<8x128xf32>
    %195 = arith.addf %190, %194 : vector<8x128xf32>
    %cst_74 = arith.constant dense<0.000000e+00> : vector<128xf32>
    %196 = vector.multi_reduction <add>, %195, %cst_74 [0] : vector<8x128xf32> to vector<128xf32>
    %197 = vector.shape_cast %196 : vector<128xf32> to vector<1x128xf32>
    %cst_75 = arith.constant -1.000000e+02 : f32
    %198 = vector.broadcast %cst_75 : f32 to vector<1x128xf32>
    %199 = arith.mulf %198, %197 : vector<1x128xf32>
    %200 = arith.addf %186, %199 : vector<1x128xf32>
    %201 = math.absf %158 : vector<8x128xf32>
    %c0_76 = arith.constant 0 : index
    %c0_77 = arith.constant 0 : index
    %202 = vector.load %arg2[%c0_76, %c0_77] : memref<48x128xf32, #tpu.memory_space<vmem>>, vector<8x128xf32>
    %203 = arith.subf %201, %202 : vector<8x128xf32>
    %cst_78 = arith.constant 0.000000e+00 : f32
    %204 = vector.broadcast %cst_78 : f32 to vector<8x128xf32>
    %205 = arith.maximumf %203, %204 : vector<8x128xf32>
    %cst_79 = arith.constant dense<0.000000e+00> : vector<128xf32>
    %206 = vector.multi_reduction <add>, %205, %cst_79 [0] : vector<8x128xf32> to vector<128xf32>
    %207 = vector.shape_cast %206 : vector<128xf32> to vector<1x128xf32>
    %cst_80 = arith.constant -1.000000e+00 : f32
    %208 = vector.broadcast %cst_80 : f32 to vector<1x128xf32>
    %209 = arith.mulf %208, %207 : vector<1x128xf32>
    %210 = arith.addf %200, %209 : vector<1x128xf32>
    %cst_81 = arith.constant 1.000000e+01 : f32
    %211 = vector.broadcast %cst_81 : f32 to vector<1x128xf32>
    %212 = arith.mulf %211, %22 : vector<1x128xf32>
    %c12 = arith.constant 12 : index
    %c0_82 = arith.constant 0 : index
    %213 = vector.load %arg1[%c12, %c0_82] : memref<80x128xf32, #tpu.memory_space<vmem>>, vector<2x128xf32>
    %214 = arith.mulf %213, %213 : vector<2x128xf32>
    %cst_83 = arith.constant dense<0.000000e+00> : vector<128xf32>
    %215 = vector.multi_reduction <add>, %214, %cst_83 [0] : vector<2x128xf32> to vector<128xf32>
    %216 = vector.shape_cast %215 : vector<128xf32> to vector<1x128xf32>
    %217 = math.sqrt %216 : vector<1x128xf32>
    %cst_84 = arith.constant -2.000000e+00 : f32
    %218 = vector.broadcast %cst_84 : f32 to vector<1x128xf32>
    %219 = arith.mulf %218, %217 : vector<1x128xf32>
    %220 = math.exp %219 : vector<1x128xf32>
    %221 = arith.mulf %4, %220 : vector<1x128xf32>
    %cst_85 = arith.constant 1.000000e+01 : f32
    %222 = vector.broadcast %cst_85 : f32 to vector<1x128xf32>
    %223 = arith.mulf %222, %221 : vector<1x128xf32>
    %224 = arith.addf %212, %223 : vector<1x128xf32>
    %cst_86 = arith.constant 1.000000e+01 : f32
    %225 = vector.broadcast %cst_86 : f32 to vector<1x128xf32>
    %226 = arith.mulf %225, %13 : vector<1x128xf32>
    %227 = arith.addf %224, %226 : vector<1x128xf32>
    %c41 = arith.constant 41 : index
    %c0_87 = arith.constant 0 : index
    %228 = vector.load %arg2[%c41, %c0_87] : memref<48x128xf32, #tpu.memory_space<vmem>>, vector<1x128xf32>
    %229 = arith.subf %0, %228 : vector<1x128xf32>
    %cst_88 = arith.constant -2.000000e+01 : f32
    %230 = vector.broadcast %cst_88 : f32 to vector<1x128xf32>
    %231 = arith.mulf %230, %229 : vector<1x128xf32>
    %232 = arith.mulf %231, %229 : vector<1x128xf32>
    %233 = math.exp %232 : vector<1x128xf32>
    %234 = arith.mulf %4, %233 : vector<1x128xf32>
    %cst_89 = arith.constant 1.000000e+01 : f32
    %235 = vector.broadcast %cst_89 : f32 to vector<1x128xf32>
    %236 = arith.mulf %235, %234 : vector<1x128xf32>
    %237 = arith.addf %227, %236 : vector<1x128xf32>
    %c72 = arith.constant 72 : index
    %c0_90 = arith.constant 0 : index
    %238 = vector.load %arg1[%c72, %c0_90] : memref<80x128xf32, #tpu.memory_space<vmem>>, vector<8x128xf32>
    %c32_91 = arith.constant 32 : index
    %c0_92 = arith.constant 0 : index
    %239 = vector.load %arg2[%c32_91, %c0_92] : memref<48x128xf32, #tpu.memory_space<vmem>>, vector<8x128xf32>
    %240 = arith.subf %238, %239 : vector<8x128xf32>
    %241 = arith.mulf %240, %240 : vector<8x128xf32>
    %cst_93 = arith.constant dense<0.000000e+00> : vector<128xf32>
    %242 = vector.multi_reduction <add>, %241, %cst_93 [0] : vector<8x128xf32> to vector<128xf32>
    %243 = vector.shape_cast %242 : vector<128xf32> to vector<1x128xf32>
    %244 = arith.mulf %4, %243 : vector<1x128xf32>
    %cst_94 = arith.constant 1.000000e+01 : f32
    %245 = vector.broadcast %cst_94 : f32 to vector<1x128xf32>
    %246 = arith.mulf %245, %244 : vector<1x128xf32>
    %247 = arith.addf %237, %246 : vector<1x128xf32>
    %cst_95 = arith.constant -2.000000e+01 : f32
    %248 = vector.broadcast %cst_95 : f32 to vector<1x128xf32>
    %249 = arith.mulf %4, %248 : vector<1x128xf32>
    %c4 = arith.constant 4 : index
    %c0_96 = arith.constant 0 : index
    %250 = vector.load %arg1[%c4, %c0_96] : memref<80x128xf32, #tpu.memory_space<vmem>>, vector<1x128xf32>
    %c5 = arith.constant 5 : index
    %c0_97 = arith.constant 0 : index
    %251 = vector.load %arg1[%c5, %c0_97] : memref<80x128xf32, #tpu.memory_space<vmem>>, vector<1x128xf32>
    %252 = arith.subf %250, %251 : vector<1x128xf32>
    %253 = math.absf %252 : vector<1x128xf32>
    %cst_98 = arith.constant 2.000000e-02 : f32
    %254 = vector.broadcast %cst_98 : f32 to vector<1x128xf32>
    %255 = arith.maximumf %253, %254 : vector<1x128xf32>
    %256 = arith.mulf %249, %255 : vector<1x128xf32>
    %cst_99 = arith.constant 2.500000e+00 : f32
    %257 = vector.broadcast %cst_99 : f32 to vector<1x128xf32>
    %258 = arith.mulf %257, %256 : vector<1x128xf32>
    %259 = arith.addf %247, %258 : vector<1x128xf32>
    %cst_100 = arith.constant 0.000000e+00 : f32
    %260 = vector.broadcast %cst_100 : f32 to vector<4x128xf32>
    %261 = tpu.concatenate %36, %150, %210, %259, %260 in 0 : vector<1x128xf32>, vector<1x128xf32>, vector<1x128xf32>, vector<1x128xf32>, vector<4x128xf32> -> vector<8x128xf32>
    %c0_101 = arith.constant 0 : index
    %c0_102 = arith.constant 0 : index
    %262 = vector.load %arg3[%c0_101, %c0_102] : memref<8x128xf32, #tpu.memory_space<vmem>>, vector<8x128xf32>
    tpu.vector_store %arg3[%c0_101, %c0_102], %261 {strides = array<i32>} : memref<8x128xf32, #tpu.memory_space<vmem>>, vector<8x128xf32>,
    return
  }
  func.func @transform_0(%arg0: i32) -> (i32, i32) {
    %c0_i32 = arith.constant 0 : i32
    %c0_i32_0 = arith.constant 0 : i32
    return %c0_i32, %arg0 : i32, i32
  }
  func.func @transform_1(%arg0: i32) -> (i32, i32) {
    %c0_i32 = arith.constant 0 : i32
    %c0_i32_0 = arith.constant 0 : i32
    %c0_i32_1 = arith.constant 0 : i32
    return %c0_i32, %c0_i32_0 : i32, i32
  }
  func.func @transform_2(%arg0: i32) -> (i32, i32) {
    %c0_i32 = arith.constant 0 : i32
    %c0_i32_0 = arith.constant 0 : i32
    return %c0_i32, %arg0 : i32, i32
  }
}

</mosaic_0001>

<bundles_post_ra>
// kernel: tpu_custom_call.1
= control target key start
LH: loop header
LB: loop body
LE: loop exit
PB: predicated region body
PF: predicated region fallthrough
CT: control target
= control target key end

     0   :  { %7 = vsyncpa [#allocation3], 0  ;;  %s641_s0 = inlined_call_operand.hbm [shape: f32[80,128], index: 0, kind: input, shape index: {}]   ;;  %s642_s1 = inlined_call_operand.hbm [shape: f32[48,128], index: 1, kind: input, shape index: {}]   ;;  %s643_s2 = inlined_call_operand.hbm [shape: f32[8,128], index: 2, kind: output, shape index: {}]  }
   0x1   :  { %8 = vsyncpa [#allocation6], 0 }
   0x2   :  { %9 = vsyncpa [#allocation4], 0  ;;  %s468_s9 = smov [#allocation2]   ;;  %s396_s13 = scalar_lea.hbm %s641_s0, 1280 }
   0x3   :  { %s15_s10 = sshll.u32 %s468_s9, 4  ;;  %p397_p0 = scmp.ne.s32.totalorder %s641_s0, %s396_s13  ;;  %s16_s10 = int_to_ptr.vmem [resolvable:$true] %s15_s10 }
   0x4   :  { %p400_p1 = scmp.lt.u32.totalorder %s396_s13, %s641_s0 }
   0x6   :  { %p402_p2 = pnand %p400_p1, %p397_p0 }
   0x8   :  { %405 = shalt.err (!%p402_p2)
}
   0x9   :  { %s406_s18 = scalar_lea.vmem %s16_s10, 1280  ;;  %p411_p4 = scmp.lt.s32.totalorder %s16_s10, %s16_s10 }
   0xa   :  { %p407_p3 = scmp.ne.s32.totalorder %s16_s10, %s406_s18  ;;  %p412_p5 = scmp.lt.s32.totalorder %s406_s18, %s406_s18 }
   0xc   :  { %p413_p6 = por %p412_p5, %p411_p4 }
   0xe   :  { %p414_p7 = pnand %p413_p6, %p407_p3 }
  0x10   :  { %417 = shalt.err (!%p414_p7)
}
  0x11   :  { %s469_s19 = smov 128   ;;  %s470_s20 = smov 8  }
  0x12   :  { %21 = dma.hbm_to_vmem [thread:$0]  %s641_s0, 1280, %s16_s10, [#allocation3], %s469_s19, %s469_s19, %s470_s20  }
  0x13   :  { %s471_s23 = smov [#allocation5]   ;;  %s418_s27 = scalar_lea.hbm %s642_s1, 768 }
  0x14   :  { %s27_s24 = sshll.u32 %s471_s23, 4  ;;  %p419_p8 = scmp.ne.s32.totalorder %s642_s1, %s418_s27  ;;  %s28_s24 = int_to_ptr.vmem [resolvable:$true] %s27_s24 }
  0x15   :  { %p422_p9 = scmp.lt.u32.totalorder %s418_s27, %s642_s1 }
  0x17   :  { %p424_p10 = pnand %p422_p9, %p419_p8 }
  0x19   :  { %427 = shalt.err (!%p424_p10)
}
  0x1a   :  { %s428_s4 = scalar_lea.vmem %s28_s24, 768  ;;  %p433_p12 = scmp.lt.s32.totalorder %s28_s24, %s28_s24 }
  0x1b   :  { %p429_p11 = scmp.ne.s32.totalorder %s28_s24, %s428_s4  ;;  %p434_p13 = scmp.lt.s32.totalorder %s428_s4, %s428_s4 }
  0x1d   :  { %p435_p0 = por %p434_p13, %p433_p12 }
  0x1f   :  { %p436_p1 = pnand %p435_p0, %p429_p11 }
  0x21   :  { %439 = shalt.err (!%p436_p1)
}
  0x22   :  { %33 = dma.hbm_to_vmem [thread:$0]  %s642_s1, 768, %s28_s24, [#allocation6], %s469_s19, %s469_s19, %s470_s20  }
  0x23   :  { %462 = dma.done.wait [#allocation3], 1280  }
  0x24   :  { %463 = vsyncadd [#allocation3], 4294966016 }
  0x25   :  { %464 = dma.done.wait [#allocation6], 768  }
  0x26   :  { %465 = vsyncadd [#allocation6], 4294966528  ;;  %v45_v0 = vld [vmem:[#allocation2 + $0xe] sm:$0x3]  ;;  %v66_v1 = vld [vmem:[#allocation2 + $0xa] sm:$0x3] }
  0x27   :  { %v46_v2 = vmul.f32 %v45_v0, %v45_v0  ;;  %v113_v3 = vld [vmem:[#allocation2 + $0x10] sm:$0x3]  ;;  %v114_v4 = vld [vmem:[#allocation2 + $0x12] sm:$0x3]  ;;  %v67_v5 = vmul.f32 %v66_v1, %v66_v1  ;;  %vm47_vm0 = vcmask 1041408   ;;  %vm181_vm1 = vcmask 1042432  }
  0x28   :  { %v115_v6 = vsub.f32 %v113_v3, %v114_v4  ;;  %v131_v15 = vld [vmem:[#allocation2 + $0x14] sm:$0x1]  ;;  %v132_v16 = vld [vmem:[#allocation2 + $0x15] sm:$0x1]  ;;  %v151_v19 = vld [vmem:[#allocation2 + $0x18] sm:$0x1] }
  0x29   :  { %v48_v7 = vsel %vm47_vm0, %v46_v2, 0.0  ;;  %v68_v9 = vsel %vm47_vm0, %v67_v5, 0.0  ;;  %v135_v18 = vadd.f32 %v132_v16, %v131_v15  ;;  %v152_v20 = vld [vmem:[#allocation2 + $0x19] sm:$0x1]  ;;  %v133_v23 = vld [vmem:[#allocation2 + $0x16] sm:$0x1] }
  0x2a   :  { %v116_v8 = vmul.f32 %v115_v6, %v115_v6  ;;  %v49_v10 = vrot.slane %v48_v7, 4  ;;  %v69_v11 = vrot.slane %v68_v9, 4  ;;  %v155_v25 = vadd.f32 %v152_v20, %v151_v19  ;;  %v516_v27 = vld [vmem:[#allocation2 + $0x1a] sm:$0x1]  ;;  %v518_v30 = vld [vmem:[#allocation2 + $0x17] sm:$0x1] }
  0x2b   :  { %v136_v26 = vadd.f32 %v135_v18, %v133_v23  ;;  %v203_v33 = vld [vmem:[#allocation2 + $0x30] sm:$0xff]  ;;  %v522_v35 = vld [vmem:[#allocation2 + $0x1b] sm:$0x1]  ;;  %v177_v41 = vld [vmem:[#allocation2 + $0x1c] sm:$0x7]  ;;  %s473_s1 = smov [#allocation7]  }
  0x2c   :  { %v117_v12 = vsel %vm47_vm0, %v116_v8, 0.0  ;;  %v50_v13 = vadd.f32 %v49_v10, %v48_v7  ;;  %v70_v17 = vadd.f32 %v69_v11, %v68_v9  ;;  %v156_v32 = vadd.f32 %v155_v25, %v516_v27  ;;  %v178_v42 = vld [vmem:[#allocation2 + $0x20] sm:$0x7]  ;;  %v96_v43 = vld [vmem:[#allocation2 + $0x6] sm:$0x1]  ;;  %v212_v4 = vld [vmem:[#allocation2 + $0x38] sm:$0xff] }
  0x2d   :  { %v118_v14 = vrot.slane %v117_v12, 4  ;;  %v137_v34 = vadd.f32 %v136_v26, %v518_v30  ;;  %v204_v39 = vmul.f32 %v203_v33, %v203_v33  ;;  %v41_v47 = vld [vmem:[#allocation5 + $0x28] sm:$0x1]  ;;  %v529_v49 = vld [vmem:[#allocation2] sm:$0x1]  ;;  %v179_v50 = vsub.f32 %v177_v41, %v178_v42  ;;  %v545_v5 = vld [vmem:[#allocation2 + $0x28] sm:$0xff] }
  0x2e   :  { %v51_v21 = vrot.slane %v50_v13, 2  ;;  %v71_v24 = vrot.slane %v70_v17, 2  ;;  %v157_v40 = vadd.f32 %v156_v32, %v522_v35  ;;  %v97_v52 = vand.u32 2147483647, %v96_v43  ;;  %v104_v53 = vld [vmem:[#allocation2 + $0x8] sm:$0x1] }
  0x2f   :  { %v119_v22 = vadd.f32 %v118_v14, %v117_v12  ;;  %v138_v44 = vmul.f32 0.25, %v137_v34  ;;  %v205_v51 = vrot.slane %v204_v39, 4  ;;  %v531_v55 = vld [vmem:[#allocation2 + $0x1] sm:$0x1]  ;;  %v87_v58 = vsub.f32 1.0, %v529_v49  ;;  %s356_s6 = sshll.u32 %s473_s1, 4  ;;  %s357_s6 = int_to_ptr.vmem [resolvable:$true] %s356_s6 }
  0x30   :  { %v52_v28 = vadd.f32 %v51_v21, %v50_v13  ;;  %v72_v31 = vadd.f32 %v71_v24, %v70_v17  ;;  %v158_v54 = vmul.f32 0.25, %v157_v40  ;;  %vm42_vm2 = vcmp.gt.f32.partialorder %v531_v55, %v41_v47  ;;  %v106_v59 = vld [vmem:[#allocation2 + $0x9] sm:$0x1]  ;;  %v282_v63 = vld [vmem:[#allocation2 + $0xc] sm:$0x3]  ;;  %v242_v47 = vld [vmem:[#allocation2 + $0x40] sm:$0xff]  ;;  %p445_p3 = scmp.lt.s32.totalorder %s357_s6, %s357_s6 }
  0x31   :  { %v120_v29 = vrot.slane %v119_v22, 2  ;;  %v139_v56 = vsub.f32 %v131_v15, %v138_v44  ;;  %v140_v57 = vsub.f32 %v132_v16, %v138_v44  ;;  %vm105_vm3 = vcmp.lt.f32.partialorder %v104_v53, -0.02  ;;  %v254_v53 = vld [vmem:[#allocation5 + $0x10] sm:$0xff]  ;;  %s440_s7 = scalar_lea.vmem %s357_s6, 128 }
  0x32   :  { %v53_v36 = vrot.slane %v52_v28, 1  ;;  %v73_v38 = vrot.slane %v72_v31, 1  ;;  %v180_v61 = vmul.f32 %v179_v50, %v179_v50  ;;  %v206_v62 = vadd.f32 %v205_v51, %v204_v39  ;;  %v243_v50 = vld [vmem:[#allocation5 + $0x8] sm:$0xff]  ;;  %p441_p2 = scmp.ne.s32.totalorder %s357_s6, %s440_s7  ;;  %p446_p4 = scmp.lt.s32.totalorder %s440_s7, %s440_s7 }
  0x33   :  { %v121_v37 = vadd.f32 %v120_v29, %v119_v22  ;;  %vm537_vm4 = vcmp.gt.f32.partialorder %v97_v52, 1.4  ;;  %vm541_vm5 = vcmp.lt.f32.partialorder %v97_v52, 0.9  ;;  %v159_v2 = vsub.f32 %v151_v19, %v158_v54 }
  0x34   :  { %v525_v45 = vadd.f32 %v53_v36, %v52_v28  ;;  %v527_v48 = vadd.f32 %v73_v38, %v72_v31  ;;  %v160_v3 = vsub.f32 %v152_v20, %v158_v54  ;;  %vm107_vm6 = vcmp.gt.f32.partialorder %v106_v59, 0.02  ;;  %vm100_vm7 = vmor %vm537_vm4, %vm541_vm5  ;;  %p447_p5 = por %p446_p4, %p445_p3 }
  0x35   :  { %v122_v46 = vrot.slane %v121_v37, 1  ;;  %v141_v6 = vsub.f32 %v133_v23, %v138_v44  ;;  %v143_v7 = vmul.f32 %v139_v56, %v139_v56  ;;  %v144_v8 = vmul.f32 %v140_v57, %v140_v57  ;;  %vm108_vm8 = vmor %vm105_vm3, %vm107_vm6 }
  0x36   :  { %378 = vrsqrt.f32 %v525_v45  ;;  %v472_v9 = vmov 0.0   ;;  %v88_v11 = vmul.f32 2.145966, %v87_v58  ;;  %v283_v13 = vmul.f32 %v282_v63, %v282_v63  ;;  %p448_p6 = pnand %p447_p5, %p441_p2 }
  0x37   :  { %v123_v60 = vadd.f32 %v122_v46, %v121_v37  ;;  %380 = vrsqrt.f32 %v527_v48  ;;  %v550_v10 = vsel %vm42_vm2, 1.0, %v472_v9  ;;  %v182_v14 = vsel %vm181_vm1, %v180_v61, 0.0 }
  0x38   :  { %v207_v15 = vrot.slane %v206_v62, 2  ;;  %v214_v16 = vmul.f32 %v212_v4, %v212_v4  ;;  %v223_v17 = vmul.f32 %v545_v5, %v212_v4  ;;  %v161_v18 = vsub.f32 %v516_v27, %v158_v54 }
  0x39   :  { %v124_v12 = vmax.f32 %v123_v60, 0.3  ;;  %v163_v19 = vmul.f32 %v159_v2, %v159_v2  ;;  %v164_v20 = vmul.f32 %v160_v3, %v160_v3  ;;  %v284_v21 = vsel %vm47_vm0, %v283_v13, 0.0 }
  0x3a   :  { %v142_v22 = vsub.f32 %v518_v30, %v138_v44  ;;  %v145_v23 = vadd.f32 %v144_v8, %v143_v7  ;;  %v146_v24 = vmul.f32 %v141_v6, %v141_v6  ;;  %v285_v25 = vrot.slane %v284_v21, 4 }
  0x3b   :  { %v562_v26 = vmul.f32 %v88_v11, %v88_v11  ;;  %v565_v28 = vsel %vm100_vm7, 1.0, %v472_v9  ;;  %v125_v29 = vmul.f32 -2.0, %v124_v12  ;;  %v183_v31 = vrot.slane %v182_v14, 4 }
  0x3c   :  { %v568_v32 = vsel %vm108_vm8, 1.0, %v472_v9  ;;  %v162_v27 = vsub.f32 %v522_v35, %v158_v54  ;;  %v571_v33 = vadd.f32 %v207_v15, %v206_v62  ;;  %v575_v30 = vmul.f32 %v545_v5, %v545_v5  ;;  %v257_v54 = vld [vmem:[#allocation5 + $0x18] sm:$0xff]  ;;  %v316_v15 = vld [vmem:[#allocation5 + $0x20] sm:$0xff] }
  0x3d   :  { %v165_v36 = vadd.f32 %v164_v20, %v163_v19  ;;  %v166_v37 = vmul.f32 %v161_v18, %v161_v18  ;;  %v215_v38 = vrot.slane %v214_v16, 4  ;;  %v224_v39 = vand.u32 2147483647, %v223_v17  ;;  %v306_v20 = vld [vmem:[#allocation5 + $0x29] sm:$0x1] }
  0x3e   :  { %vm57_vm9 = vcmp.eq.f32.partialorder %v525_v45, inf  ;;  %v147_v41 = vadd.f32 %v146_v24, %v145_v23  ;;  %v148_v42 = vmul.f32 %v142_v22, %v142_v22  ;;  %v286_v43 = vadd.f32 %v285_v25, %v284_v21 }
  0x3f   :  { %vm59_vm10 = vcmp.eq.f32.partialorder %v525_v45, 0.0  ;;  %v60_v35 = vand.u32 2147483648, %v525_v45  ;;  %v126_v44 = vmul.f32 1.442695, %v125_v29  ;;  %v184_v46 = vadd.f32 %v183_v31, %v182_v14  ;;  %v315_v14 = vld [vmem:[#allocation2 + $0x48] sm:$0xff]  ;;  %v270_v31 = vld [vmem:[#allocation5] sm:$0xff] }
  0x40   :  { %v379_v34 = vpop.eup %378  ;;  %vm77_vm11 = vcmp.eq.f32.partialorder %v527_v48, inf  ;;  %v168_v52 = vmul.f32 %v162_v27, %v162_v27  ;;  %v287_v56 = vrot.slane %v286_v43, 2  ;;  %v167_v58 = vadd.f32 %v166_v37, %v165_v36 }
  0x41   :  { %v381_v40 = vpop.eup %380  ;;  %v56_v51 = vmul.f32 %v379_v34, %v525_v45  ;;  %v216_v59 = vadd.f32 %v215_v38, %v214_v16  ;;  %v225_v60 = vrot.slane %v224_v39, 4  ;;  %vm79_vm12 = vcmp.eq.f32.partialorder %v527_v48, 0.0 }
  0x42   :  { %v76_v57 = vmul.f32 %v381_v40, %v527_v48  ;;  %v149_v61 = vadd.f32 %v148_v42, %v147_v41  ;;  %v244_v62 = vsub.f32 %v242_v47, %v243_v50  ;;  %v288_v63 = vadd.f32 %v287_v56, %v286_v43  ;;  %v195_v42 = vld [vmem:[#allocation2 + $0x3] sm:$0x1] }
  0x43   :  { %382 = vpow2.f32 %v126_v44  ;;  %v185_v0 = vrot.slane %v184_v46, 2  ;;  %v255_v1 = vsub.f32 %v242_v47, %v254_v53  ;;  %v258_v2 = vsub.f32 %v242_v47, %v257_v54 }
  0x44   :  { %v58_v3 = vsel %vm57_vm9, %v525_v45, %v56_v51  ;;  %v80_v4 = vand.u32 2147483648, %v527_v48  ;;  %v209_v6 = vrot.slane %v571_v33, 1  ;;  %v289_v7 = vrot.slane %v288_v63, 1 }
  0x45   :  { %v78_v8 = vsel %vm77_vm11, %v527_v48, %v76_v57  ;;  %v169_v11 = vadd.f32 %v168_v52, %v167_v58  ;;  %v217_v12 = vrot.slane %v216_v59, 2  ;;  %v226_v13 = vadd.f32 %v225_v60, %v224_v39 }
  0x46   :  { %v150_v16 = vmul.f32 0.33333334, %v149_v61  ;;  %v234_v17 = vrot.slane %v575_v30, 4  ;;  %v245_v18 = vmul.f32 %v244_v62, %v244_v62  ;;  %v593_v19 = vadd.f32 %v289_v7, %v288_v63 }
  0x47   :  { %v186_v21 = vadd.f32 %v185_v0, %v184_v46  ;;  %v256_v22 = vmin.f32 %v255_v1, 0.0  ;;  %v259_v23 = vmax.f32 %v258_v2, 0.0  ;;  %v269_v24 = vand.u32 2147483647, %v545_v5 }
  0x48   :  { %v61_v25 = vsel %vm59_vm10, %v60_v35, %v58_v3  ;;  %v81_v29 = vsel %vm79_vm12, %v80_v4, %v78_v8  ;;  %384 = vrsqrt.f32 %v593_v19  ;;  %v317_v27 = vsub.f32 %v315_v14, %v316_v15 }
  0x49   :  { %v170_v34 = vmul.f32 0.33333334, %v169_v11  ;;  %v218_v36 = vadd.f32 %v217_v12, %v216_v59  ;;  %v227_v37 = vrot.slane %v226_v13, 2  ;;  %v307_v38 = vsub.f32 %v531_v55, %v306_v20 }
  0x4a   :  { %v103_v39 = vmul.f32 -1.0, %v565_v28  ;;  %v111_v40 = vmul.f32 0.025, %v568_v32  ;;  %v235_v5 = vadd.f32 %v234_v17, %v575_v30  ;;  %v246_v45 = vrot.slane %v245_v18, 4 }
  0x4b   :  { %v187_v41 = vrot.slane %v186_v21, 1  ;;  %v210_v48 = vadd.f32 %v209_v6, %v571_v33  ;;  %v260_v43 = vadd.f32 %v259_v23, %v256_v22  ;;  %v271_v35 = vsub.f32 %v269_v24, %v270_v31  ;;  %v194_v22 = vld [vmem:[#allocation2 + $0x2] sm:$0x1] }
  0x4c   :  { %v62_v44 = vmul.f32 -2.0, %v61_v25  ;;  %v82_v46 = vmul.f32 -2.0, %v81_v29  ;;  %v90_v47 = vmul.f32 -0.5, %v562_v26  ;;  %v318_v50 = vmul.f32 %v317_v27, %v317_v27 }
  0x4d   :  { %v383_v51 = vpop.eup %382  ;;  %v171_v55 = vadd.f32 %v170_v34, %v150_v16  ;;  %v219_v52 = vrot.slane %v218_v36, 1  ;;  %v228_v28 = vadd.f32 %v227_v37, %v226_v13  ;;  %v308_v53 = vmul.f32 -20.0, %v307_v38 }
  0x4e   :  { %v112_v32 = vadd.f32 %v111_v40, %v103_v39  ;;  %v607_v54 = vmul.f32 3.0, %v195_v42  ;;  %v236_v30 = vrot.slane %v235_v5, 2  ;;  %v247_v56 = vadd.f32 %v246_v45, %v245_v18  ;;  %v329_v42 = vld [vmem:[#allocation2 + $0x4] sm:$0x1] }
  0x4f   :  { %v188_v57 = vadd.f32 %v187_v41, %v186_v21  ;;  %v211_v58 = vmul.f32 -2.5e-07, %v210_v48  ;;  %v261_v33 = vrot.slane %v260_v43, 4  ;;  %v272_v59 = vmax.f32 %v271_v35, 0.0  ;;  %v330_v48 = vld [vmem:[#allocation2 + $0x5] sm:$0x1] }
  0x50   :  { %v63_v60 = vmul.f32 1.442695, %v62_v44  ;;  %v83_v61 = vmul.f32 1.442695, %v82_v46  ;;  %v128_v62 = vmul.f32 %v383_v51, %v550_v10  ;;  %v319_v26 = vrot.slane %v318_v50, 4 }
  0x51   :  { %v172_v63 = vmul.f32 0.5, %v171_v55  ;;  %v220_v0 = vadd.f32 %v219_v52, %v218_v36  ;;  %v229_v1 = vrot.slane %v228_v28, 1  ;;  %v309_v2 = vmul.f32 %v308_v53, %v307_v38 }
  0x52   :  { %v385_v3 = vpop.eup %384  ;;  %v237_v4 = vadd.f32 %v236_v30, %v235_v5  ;;  %v248_v6 = vrot.slane %v247_v56, 2  ;;  %vm293_vm13 = vcmp.eq.f32.partialorder %v593_v19, inf  ;;  %v296_v7 = vand.u32 2147483648, %v593_v19 }
  0x53   :  { %v262_v8 = vadd.f32 %v261_v33, %v260_v43  ;;  %v273_v11 = vrot.slane %v272_v59, 4  ;;  %v292_v12 = vmul.f32 %v385_v3, %v593_v19  ;;  %vm295_vm14 = vcmp.eq.f32.partialorder %v593_v19, 0.0 }
  0x54   :  { %386 = vpow2.f32 %v83_v61  ;;  %v129_v13 = vmul.f32 -2.5, %v128_v62  ;;  %vm189_vm15 = vcmp.gt.f32.partialorder %v188_v57, 0.9  ;;  %v320_v14 = vadd.f32 %v319_v26, %v318_v50 }
  0x55   :  { %388 = vpow2.f32 %v63_v60  ;;  %vm173_vm2 = vcmp.lt.f32.partialorder %v172_v63, 0.05  ;;  %v294_v15 = vsel %vm293_vm13, %v593_v19, %v292_v12  ;;  %v310_v16 = vmul.f32 1.442695, %v309_v2 }
  0x56   :  { %v221_v17 = vmul.f32 -2.5e-06, %v220_v0  ;;  %v230_v18 = vadd.f32 %v229_v1, %v228_v28  ;;  %v238_v20 = vrot.slane %v237_v4, 1  ;;  %v297_v21 = vsel %vm295_vm14, %v296_v7, %v294_v15 }
  0x57   :  { %v249_v23 = vadd.f32 %v248_v6, %v247_v56  ;;  %v263_v24 = vrot.slane %v262_v8, 2  ;;  %v274_v25 = vadd.f32 %v273_v11, %v272_v59  ;;  %v298_v29 = vmul.f32 -2.0, %v297_v21 }
  0x58   :  { %v91_v31 = vmul.f32 1.442695, %v90_v47  ;;  %v130_v27 = vadd.f32 %v129_v13, %v112_v32  ;;  %v321_v34 = vrot.slane %v320_v14, 2  ;;  %v369_v36 = vsel %vm173_vm2, 1.0, %v472_v9 }
  0x59   :  { %v370_v37 = vsel %vm189_vm15, 1.0, %v472_v9  ;;  %v299_v38 = vmul.f32 1.442695, %v298_v29  ;;  %390 = vpow2.f32 %v310_v16  ;;  %vm197_vm3 = vcmp.gt.f32.partialorder %v194_v22, %v607_v54 }
  0x5a   :  { %v222_v19 = vadd.f32 %v221_v17, %v211_v58  ;;  %v231_v39 = vmul.f32 -2.5e-05, %v230_v18  ;;  %v239_v40 = vadd.f32 %v238_v20, %v237_v4  ;;  %v250_v5 = vrot.slane %v249_v23, 1 }
  0x5b   :  { %v264_v45 = vadd.f32 %v263_v24, %v262_v8  ;;  %v275_v41 = vrot.slane %v274_v25, 2  ;;  %392 = vpow2.f32 %v299_v38  ;;  %v176_v43 = vadd.f32 %v369_v36, %v130_v27 }
  0x5c   :  { %394 = vpow2.f32 %v91_v31  ;;  %v192_v35 = vmul.f32 20.0, %v370_v37  ;;  %v322_v44 = vadd.f32 %v321_v34, %v320_v14  ;;  %v371_v46 = vsel %vm197_vm3, 1.0, %v472_v9 }
  0x5d   :  { %v232_v50 = vadd.f32 %v231_v39, %v222_v19  ;;  %v331_v51 = vsub.f32 %v329_v42, %v330_v48  ;;  %v240_v52 = vmul.f32 -0.0001, %v239_v40  ;;  %v251_v28 = vadd.f32 %v250_v5, %v249_v23 }
  0x5e   :  { %v387_v47 = vpop.eup %386  ;;  %v265_v53 = vrot.slane %v264_v45, 1  ;;  %v276_v32 = vadd.f32 %v275_v41, %v274_v25  ;;  %v193_v54 = vadd.f32 %v192_v35, %v176_v43  ;;  %v200_v30 = vmul.f32 -10.0, %v371_v46 }
  0x5f   :  { %v389_v55 = vpop.eup %388  ;;  %v323_v56 = vrot.slane %v322_v44, 1  ;;  %v85_v57 = vmul.f32 %v387_v47, %v550_v10  ;;  %v332_v58 = vand.u32 2147483647, %v331_v51  ;;  %v241_v59 = vadd.f32 %v240_v52, %v232_v50 }
  0x60   :  { %v252_v60 = vmul.f32 -0.25, %v251_v28  ;;  %v266_v61 = vadd.f32 %v265_v53, %v264_v45  ;;  %v277_v62 = vrot.slane %v276_v32, 1  ;;  %v65_v9 = vmul.f32 %v389_v55, %v550_v10 }
  0x61   :  { %v201_v26 = vadd.f32 %v200_v30, %v193_v54  ;;  %v324_v63 = vadd.f32 %v323_v56, %v322_v44  ;;  %vm93_vm4 = vcmp.lt.f32.partialorder %v529_v49, 1.0  ;;  %v281_v1 = vmul.f32 10.0, %v85_v57 }
  0x62   :  { %v328_v6 = vmul.f32 -20.0, %v550_v10  ;;  %v333_v7 = vmax.f32 %v332_v58, 0.02  ;;  %v253_v8 = vadd.f32 %v252_v60, %v241_v59  ;;  %v267_v11 = vmul.f32 -100.0, %v266_v61 }
  0x63   :  { %v391_v33 = vpop.eup %390  ;;  %v278_v12 = vadd.f32 %v277_v62, %v276_v32  ;;  %v202_v13 = vadd.f32 %v201_v26, %v85_v57  ;;  %v304_v15 = vmul.f32 10.0, %v65_v9  ;;  %v325_v16 = vmul.f32 %v550_v10, %v324_v63 }
  0x64   :  { %v312_v4 = vmul.f32 %v391_v33, %v550_v10  ;;  %v334_v20 = vmul.f32 %v333_v7, %v328_v6  ;;  %v268_v21 = vadd.f32 %v267_v11, %v253_v8  ;;  %vm343_vm5 = vcmask 1040384  }
  0x65   :  { %v393_v0 = vpop.eup %392  ;;  %v279_v22 = vmul.f32 -1.0, %v278_v12  ;;  %v326_v25 = vmul.f32 10.0, %v325_v16  ;;  %v338_v29 = vrot.slane %v202_v13, 7  ;;  %vm347_vm6 = vcmask 1043456  }
  0x66   :  { %v395_v2 = vpop.eup %394  ;;  %v301_v3 = vmul.f32 %v393_v0, %v550_v10  ;;  %v313_v49 = vmul.f32 10.0, %v312_v4  ;;  %v335_v27 = vmul.f32 2.5, %v334_v20 }
  0x67   :  { %v94_v17 = vsel %vm93_vm4, %v395_v2, 0.0  ;;  %v280_v34 = vadd.f32 %v279_v22, %v268_v21 }
  0x68   :  { %v302_v14 = vmul.f32 10.0, %v301_v3  ;;  %v95_v23 = vadd.f32 %v94_v17, %v65_v9 }
  0x6a   :  { %v303_v18 = vadd.f32 %v302_v14, %v281_v1  ;;  %v344_v37 = vsel %vm343_vm5, %v95_v23, %v338_v29 }
  0x6b   :  { %v345_v19 = vsel %vm47_vm0, %v344_v37, %v280_v34 }
  0x6c   :  { %v305_v24 = vadd.f32 %v304_v15, %v303_v18 }
  0x6e   :  { %v314_v31 = vadd.f32 %v313_v49, %v305_v24 }
  0x70   :  { %v327_v36 = vadd.f32 %v326_v25, %v314_v31 }
  0x72   :  { %v336_v38 = vadd.f32 %v335_v27, %v327_v36 }
  0x74   :  { %v341_v10 = vrot.slane %v336_v38, 5 }
  0x76   :  { %v346_v39 = vsel %vm181_vm1, %v345_v19, %v341_v10 }
  0x77   :  { %v348_v40 = vsel %vm347_vm6, %v346_v39, 0.0 }
  0x78   :  { %349 = vst [vmem:[#allocation7] sm:$0xff] %v348_v40 }
  0x79   :  { %451 = shalt.err (!%p448_p6)
}
  0x7a   :  { %s452_s10 = scalar_lea.hbm %s643_s2, 128 }
  0x7b   :  { %p453_p7 = scmp.ne.s32.totalorder %s643_s2, %s452_s10  ;;  %p456_p8 = scmp.lt.u32.totalorder %s452_s10, %s643_s2 }
  0x7d   :  { %p458_p9 = pnand %p456_p8, %p453_p7 }
  0x7f   :  { %461 = shalt.err (!%p458_p9)
}
  0x80   :  { %359 = dma.vmem_to_hbm [thread:$0]  %s357_s6, 128, %s643_s2, [#allocation4]  }
  0x81   :  { %466 = dma.done.wait [#allocation4], 128  }
  0x82   :  { %467 = vsyncadd [#allocation4], 4294967168 }
  0x83   :  { %363 = vsyncpa [#allocation3], 1 }
  0x84   :  { %364 = vsyncpa [#allocation6], 1 }
  0x85   :  { %365 = vsyncpa [#allocation4], 1 }

</bundles_post_ra>
